<compile_context>
chip_gen: v5e
topology: v5e:2x2
jax: 0.10.0
libtpu: 0.0.40
codegen_flags: <defaults>
</compile_context>

<pallas_src>
import jax
import jax.numpy as jnp
from jax.experimental import pallas as pl
from jax.experimental.pallas import tpu as pltpu

_LANE = 128
_SUBLANE = 8


def _round_up(x, m):
    return ((x + m - 1) // m) * m


def _mlp_kernel(x_ref, *refs):
    """refs = (w0, b0, w1, b1, ..., wL, bL, out_ref).

    Fully fused MLP: each layer is one MXU matmul plus an f32 bias add; ReLU
    on every layer except the last. Hidden-layer feeds are bf16 (cast on the
    VPU, f32 accumulation); the final layer is computed entirely in f32.
    Dropout is identity at inference, so it is a no-op here.
    """
    out_ref = refs[-1]
    wb_refs = refs[:-1]
    n_total = len(wb_refs) // 2

    h = x_ref[...]  # f32 (TILE_M, in_dim)
    for li in range(n_total):
        w = wb_refs[2 * li][...]        # bf16 (hidden) / f32 (last): (fan_in, fan_out)
        b = wb_refs[2 * li + 1][...]    # f32  (1, fan_out)
        lhs = h.astype(w.dtype)         # bf16 cast inside kernel (free vs MXU)
        h = jnp.dot(lhs, w, preferred_element_type=jnp.float32) + b
        if li < n_total - 1:
            h = jnp.maximum(h, 0.0)     # ReLU (VPU, f32)
    out_ref[...] = h.astype(out_ref.dtype)


def forecasting_model_pallas(x, weights, biases, *, tile_m=4096):
    """x: (b, n, in_dim) f32. weights[i]: (fan_in_i, fan_out_i), biases[i]: (fan_out_i,)."""
    b, n, in_dim = x.shape
    out_dim = weights[-1].shape[1]
    M = b * n
    x2d = x.reshape(M, in_dim)

    # ---- tiling over M -----------------------------------------------------
    # Sublane-aligned tile, capped so the grid has >= 2 steps whenever M > 8
    # (keeps both v7x TensorCores fed; negligible overhead on v5e/v6e).
    half_m = _round_up(max(pl.cdiv(M, 2), _SUBLANE), _SUBLANE)
    tile_m_eff = max(min(_round_up(tile_m, _SUBLANE), half_m), _SUBLANE)
    M_pad = _round_up(M, tile_m_eff)
    if M_pad != M:
        x2d = jnp.pad(x2d, ((0, M_pad - M), (0, 0)))

    # ---- weights: bf16 for hidden layers, f32 for the (tiny) last layer ----
    n_total = len(weights)
    w_prep = [
        w.astype(jnp.bfloat16) if i < n_total - 1 else w.astype(jnp.float32)
        for i, w in enumerate(weights)
    ]
    b_prep = [bb.reshape(1, -1).astype(jnp.float32) for bb in biases]

    # ---- specs --------------------------------------------------------------
    wb_args, wb_specs = [], []
    for w, bb in zip(w_prep, b_prep):
        wb_args.extend([w, bb])
        # Full-array blocks, pinned at (0,0): VMEM-resident across all steps.
        wb_specs.append(pl.BlockSpec(w.shape, lambda i: (0, 0)))
        wb_specs.append(pl.BlockSpec(bb.shape, lambda i: (0, 0)))

    grid = (M_pad // tile_m_eff,)
    in_specs = [pl.BlockSpec((tile_m_eff, in_dim), lambda i: (i, 0))] + wb_specs
    # Output block last dim equals the full array dim -> legal without lane pad.
    out_spec = pl.BlockSpec((tile_m_eff, out_dim), lambda i: (i, 0))

    flops = 2 * M_pad * sum(w.shape[0] * w.shape[1] for w in w_prep)
    bytes_accessed = (
        M_pad * in_dim * 4                                    # x (f32, read)
        + sum(w.size * w.dtype.itemsize for w in w_prep)      # weights
        + sum(bb.size * 4 for bb in b_prep)                   # biases
        + M_pad * out_dim * 4                                 # output (f32, write)
    )

    out2d = pl.pallas_call(
        _mlp_kernel,
        out_shape=jax.ShapeDtypeStruct((M_pad, out_dim), x.dtype),
        grid_spec=pltpu.PrefetchScalarGridSpec(
            num_scalar_prefetch=0,
            grid=grid,
            in_specs=in_specs,
            out_specs=out_spec,
        ),
        compiler_params=pltpu.CompilerParams(
            dimension_semantics=("parallel",),      # row tiles split across TCs (v7x)
            vmem_limit_bytes=32 * 1024 * 1024,      # ample: tiles are a few hundred KB
        ),
        cost_estimate=pl.CostEstimate(
            flops=flops, transcendentals=0, bytes_accessed=bytes_accessed
        ),
    )(x2d, *wb_args)

    return out2d[:M].reshape(b, n, out_dim)


def init_params(key, in_dim, hid_dim, out_dim, n_layers):
    """Deterministic init matching nn.Linear shapes (U(-1/sqrt(fan_in), +1/sqrt(fan_in)))."""
    dims = [in_dim] + [hid_dim] * n_layers + [out_dim]
    weights, biases = [], []
    for i in range(len(dims) - 1):
        fan_in, fan_out = dims[i], dims[i + 1]
        key, kw, kb = jax.random.split(key, 3)
        bound = 1.0 / jnp.sqrt(jnp.float32(fan_in))
        # Stored as (fan_in, fan_out): transpose of torch's (fan_out, fan_in).
        weights.append(
            jax.random.uniform(kw, (fan_in, fan_out), jnp.float32, -bound, bound)
        )
        biases.append(
            jax.random.uniform(kb, (fan_out,), jnp.float32, -bound, bound)
        )
    return weights, biases


def reference_forward(x, weights, biases):
    """Pure-JAX f32 reference of the PyTorch forward (dropout in eval = identity)."""
    h = x
    for i in range(len(weights) - 1):
        h = jnp.maximum(h @ weights[i] + biases[i], 0.0)
    return h @ weights[-1] + biases[-1]


if __name__ == "__main__":
    # TODO(synk): dropout is implemented as identity (eval-mode); training-mode
    # stochastic dropout (pltpu PRNG) is not emitted here.
    key = jax.random.PRNGKey(0)

    # ---- small shapes consistent with the (b, n, k) module input -----------
    b, n = 2, 8          # batch, window size
    in_dim = 16          # k: number of input features
    hid_dim = 32
    out_dim = 4
    n_layers = 3

    key, kx, kp = jax.random.split(key, 3)
    x = jax.random.normal(kx, (b, n, in_dim), jnp.float32)
    weights, biases = init_params(kp, in_dim, hid_dim, out_dim, n_layers)

    out = forecasting_model_pallas(x, weights, biases)
    out = jax.block_until_ready(out)
    ref = reference_forward(x, weights, biases)
    assert out.shape == (b, n, out_dim)
    # Hidden layers use bf16 MXU feeds (f32 accumulate); last layer is f32.
    assert jnp.allclose(out, ref, atol=3e-2, rtol=3e-2), "mismatch vs reference (small)"

    # ---- second check: exercises multi-tile grid + M padding ---------------
    b2, n2 = 2, 300      # M = 600 -> tile 304, M_pad 608, grid = (2,)
    key, kx2, kp2 = jax.random.split(key, 3)
    x2 = jax.random.normal(kx2, (b2, n2, in_dim), jnp.float32)
    w2, bi2 = init_params(kp2, in_dim, hid_dim, out_dim, n_layers)
    out2 = jax.block_until_ready(forecasting_model_pallas(x2, w2, bi2))
    ref2 = reference_forward(x2, w2, bi2)
    assert out2.shape == (b2, n2, out_dim)
    assert jnp.allclose(out2, ref2, atol=3e-2, rtol=3e-2), "mismatch vs reference (tiled)"

    print("KERNEL_OK")
</pallas_src>

<mosaic_0001>
module attributes {stable_mosaic.version = 11 : i64} {
  func.func @_mlp_kernel(%arg0: i32, %arg1: memref<8x16xf32, #tpu.memory_space<vmem>>, %arg2: memref<16x32xbf16, #tpu.memory_space<vmem>>, %arg3: memref<1x32xf32, #tpu.memory_space<vmem>>, %arg4: memref<32x32xbf16, #tpu.memory_space<vmem>>, %arg5: memref<1x32xf32, #tpu.memory_space<vmem>>, %arg6: memref<32x32xbf16, #tpu.memory_space<vmem>>, %arg7: memref<1x32xf32, #tpu.memory_space<vmem>>, %arg8: memref<32x4xf32, #tpu.memory_space<vmem>>, %arg9: memref<1x4xf32, #tpu.memory_space<vmem>>, %arg10: memref<8x4xf32, #tpu.memory_space<vmem>>) attributes {dimension_semantics = [#tpu.dimension_semantics<parallel>], iteration_bounds = array<i64: 2>, scalar_prefetch = 0 : i64, scratch_operands = 0 : i64, tpu.core_type = #tpu.core_type<tc>, window_params = [{transform_indices = @transform_0, window_bounds = array<i64: 8, 16>}, {pipeline_mode = #tpu.pipeline_mode<synchronous>, transform_indices = @transform_1, window_bounds = array<i64: 16, 32>}, {pipeline_mode = #tpu.pipeline_mode<synchronous>, transform_indices = @transform_2, window_bounds = array<i64: 1, 32>}, {pipeline_mode = #tpu.pipeline_mode<synchronous>, transform_indices = @transform_3, window_bounds = array<i64: 32, 32>}, {pipeline_mode = #tpu.pipeline_mode<synchronous>, transform_indices = @transform_4, window_bounds = array<i64: 1, 32>}, {pipeline_mode = #tpu.pipeline_mode<synchronous>, transform_indices = @transform_5, window_bounds = array<i64: 32, 32>}, {pipeline_mode = #tpu.pipeline_mode<synchronous>, transform_indices = @transform_6, window_bounds = array<i64: 1, 32>}, {pipeline_mode = #tpu.pipeline_mode<synchronous>, transform_indices = @transform_7, window_bounds = array<i64: 32, 4>}, {pipeline_mode = #tpu.pipeline_mode<synchronous>, transform_indices = @transform_8, window_bounds = array<i64: 1, 4>}, {transform_indices = @transform_9, window_bounds = array<i64: 8, 4>}]} {
    %c0 = arith.constant 0 : index
    %c0_0 = arith.constant 0 : index
    %0 = vector.load %arg1[%c0, %c0_0] : memref<8x16xf32, #tpu.memory_space<vmem>>, vector<8x16xf32>
    %c0_1 = arith.constant 0 : index
    %c0_2 = arith.constant 0 : index
    %1 = vector.load %arg2[%c0_1, %c0_2] : memref<16x32xbf16, #tpu.memory_space<vmem>>, vector<16x32xbf16>
    %c0_3 = arith.constant 0 : index
    %c0_4 = arith.constant 0 : index
    %2 = vector.load %arg3[%c0_3, %c0_4] : memref<1x32xf32, #tpu.memory_space<vmem>>, vector<1x32xf32>
    %3 = arith.truncf %0 : vector<8x16xf32> to vector<8x16xbf16>
    %cst = arith.constant dense<0.000000e+00> : vector<8x32xf32>
    %4 = tpu.matmul %3, %1, %cst {dimension_numbers = #tpu.dot_dimension_numbers<[1], [0], [0], [1], [0, 0, 1, 1], [], []>} : vector<8x16xbf16>, vector<16x32xbf16>, vector<8x32xf32> -> vector<8x32xf32>
    %5 = vector.broadcast %2 : vector<1x32xf32> to vector<8x32xf32>
    %6 = arith.addf %4, %5 : vector<8x32xf32>
    %cst_5 = arith.constant 0.000000e+00 : f32
    %7 = vector.broadcast %cst_5 : f32 to vector<8x32xf32>
    %8 = arith.maximumf %6, %7 : vector<8x32xf32>
    %c0_6 = arith.constant 0 : index
    %c0_7 = arith.constant 0 : index
    %9 = vector.load %arg4[%c0_6, %c0_7] : memref<32x32xbf16, #tpu.memory_space<vmem>>, vector<32x32xbf16>
    %c0_8 = arith.constant 0 : index
    %c0_9 = arith.constant 0 : index
    %10 = vector.load %arg5[%c0_8, %c0_9] : memref<1x32xf32, #tpu.memory_space<vmem>>, vector<1x32xf32>
    %11 = arith.truncf %8 : vector<8x32xf32> to vector<8x32xbf16>
    %cst_10 = arith.constant dense<0.000000e+00> : vector<8x32xf32>
    %12 = tpu.matmul %11, %9, %cst_10 {dimension_numbers = #tpu.dot_dimension_numbers<[1], [0], [0], [1], [0, 0, 1, 1], [], []>} : vector<8x32xbf16>, vector<32x32xbf16>, vector<8x32xf32> -> vector<8x32xf32>
    %13 = vector.broadcast %10 : vector<1x32xf32> to vector<8x32xf32>
    %14 = arith.addf %12, %13 : vector<8x32xf32>
    %cst_11 = arith.constant 0.000000e+00 : f32
    %15 = vector.broadcast %cst_11 : f32 to vector<8x32xf32>
    %16 = arith.maximumf %14, %15 : vector<8x32xf32>
    %c0_12 = arith.constant 0 : index
    %c0_13 = arith.constant 0 : index
    %17 = vector.load %arg6[%c0_12, %c0_13] : memref<32x32xbf16, #tpu.memory_space<vmem>>, vector<32x32xbf16>
    %c0_14 = arith.constant 0 : index
    %c0_15 = arith.constant 0 : index
    %18 = vector.load %arg7[%c0_14, %c0_15] : memref<1x32xf32, #tpu.memory_space<vmem>>, vector<1x32xf32>
    %19 = arith.truncf %16 : vector<8x32xf32> to vector<8x32xbf16>
    %cst_16 = arith.constant dense<0.000000e+00> : vector<8x32xf32>
    %20 = tpu.matmul %19, %17, %cst_16 {dimension_numbers = #tpu.dot_dimension_numbers<[1], [0], [0], [1], [0, 0, 1, 1], [], []>} : vector<8x32xbf16>, vector<32x32xbf16>, vector<8x32xf32> -> vector<8x32xf32>
    %21 = vector.broadcast %18 : vector<1x32xf32> to vector<8x32xf32>
    %22 = arith.addf %20, %21 : vector<8x32xf32>
    %cst_17 = arith.constant 0.000000e+00 : f32
    %23 = vector.broadcast %cst_17 : f32 to vector<8x32xf32>
    %24 = arith.maximumf %22, %23 : vector<8x32xf32>
    %c0_18 = arith.constant 0 : index
    %c0_19 = arith.constant 0 : index
    %25 = vector.load %arg8[%c0_18, %c0_19] : memref<32x4xf32, #tpu.memory_space<vmem>>, vector<32x4xf32>
    %c0_20 = arith.constant 0 : index
    %c0_21 = arith.constant 0 : index
    %26 = vector.load %arg9[%c0_20, %c0_21] : memref<1x4xf32, #tpu.memory_space<vmem>>, vector<1x4xf32>
    %cst_22 = arith.constant dense<0.000000e+00> : vector<8x4xf32>
    %27 = tpu.matmul %24, %25, %cst_22 {dimension_numbers = #tpu.dot_dimension_numbers<[1], [0], [0], [1], [0, 0, 1, 1], [], []>} : vector<8x32xf32>, vector<32x4xf32>, vector<8x4xf32> -> vector<8x4xf32>
    %28 = vector.broadcast %26 : vector<1x4xf32> to vector<8x4xf32>
    %29 = arith.addf %27, %28 : vector<8x4xf32>
    %c0_23 = arith.constant 0 : index
    %c0_24 = arith.constant 0 : index
    %30 = vector.load %arg10[%c0_23, %c0_24] : memref<8x4xf32, #tpu.memory_space<vmem>>, vector<8x4xf32>
    tpu.vector_store %arg10[%c0_23, %c0_24], %29 {strides = array<i32>} : memref<8x4xf32, #tpu.memory_space<vmem>>, vector<8x4xf32>,
    return
  }
  func.func @transform_0(%arg0: i32) -> (i32, i32) {
    %c0_i32 = arith.constant 0 : i32
    %c0_i32_0 = arith.constant 0 : i32
    return %arg0, %c0_i32 : i32, i32
  }
  func.func @transform_1(%arg0: i32) -> (i32, i32) {
    %c0_i32 = arith.constant 0 : i32
    %c0_i32_0 = arith.constant 0 : i32
    %c0_i32_1 = arith.constant 0 : i32
    return %c0_i32, %c0_i32_0 : i32, i32
  }
  func.func @transform_2(%arg0: i32) -> (i32, i32) {
    %c0_i32 = arith.constant 0 : i32
    %c0_i32_0 = arith.constant 0 : i32
    %c0_i32_1 = arith.constant 0 : i32
    return %c0_i32, %c0_i32_0 : i32, i32
  }
  func.func @transform_3(%arg0: i32) -> (i32, i32) {
    %c0_i32 = arith.constant 0 : i32
    %c0_i32_0 = arith.constant 0 : i32
    %c0_i32_1 = arith.constant 0 : i32
    return %c0_i32, %c0_i32_0 : i32, i32
  }
  func.func @transform_4(%arg0: i32) -> (i32, i32) {
    %c0_i32 = arith.constant 0 : i32
    %c0_i32_0 = arith.constant 0 : i32
    %c0_i32_1 = arith.constant 0 : i32
    return %c0_i32, %c0_i32_0 : i32, i32
  }
  func.func @transform_5(%arg0: i32) -> (i32, i32) {
    %c0_i32 = arith.constant 0 : i32
    %c0_i32_0 = arith.constant 0 : i32
    %c0_i32_1 = arith.constant 0 : i32
    return %c0_i32, %c0_i32_0 : i32, i32
  }
  func.func @transform_6(%arg0: i32) -> (i32, i32) {
    %c0_i32 = arith.constant 0 : i32
    %c0_i32_0 = arith.constant 0 : i32
    %c0_i32_1 = arith.constant 0 : i32
    return %c0_i32, %c0_i32_0 : i32, i32
  }
  func.func @transform_7(%arg0: i32) -> (i32, i32) {
    %c0_i32 = arith.constant 0 : i32
    %c0_i32_0 = arith.constant 0 : i32
    %c0_i32_1 = arith.constant 0 : i32
    return %c0_i32, %c0_i32_0 : i32, i32
  }
  func.func @transform_8(%arg0: i32) -> (i32, i32) {
    %c0_i32 = arith.constant 0 : i32
    %c0_i32_0 = arith.constant 0 : i32
    %c0_i32_1 = arith.constant 0 : i32
    return %c0_i32, %c0_i32_0 : i32, i32
  }
  func.func @transform_9(%arg0: i32) -> (i32, i32) {
    %c0_i32 = arith.constant 0 : i32
    %c0_i32_0 = arith.constant 0 : i32
    return %arg0, %c0_i32 : i32, i32
  }
}

</mosaic_0001>

<bundles_post_ra>
// kernel: tpu_custom_call.1
= control target key start
LH: loop header
LB: loop body
LE: loop exit
PB: predicated region body
PF: predicated region fallthrough
CT: control target
= control target key end

     0   :  { %14 = vsyncpa [#allocation3], 0  ;;  %s863_s0 = inlined_call_operand.vmem [shape: f32[16,16], index: 0, kind: input, shape index: {}]   ;;  %s864_s1 = inlined_call_operand.hbm [shape: bf16[16,32], index: 1, kind: input, shape index: {}]   ;;  %s865_s2 = inlined_call_operand.vmem [shape: f32[1,32], index: 2, kind: input, shape index: {}]   ;;  %s866_s3 = inlined_call_operand.vmem [shape: bf16[32,32], index: 3, kind: input, shape index: {}]   ;;  %s867_s4 = inlined_call_operand.vmem [shape: f32[1,32], index: 4, kind: input, shape index: {}]   ;;  %s868_s5 = inlined_call_operand.hbm [shape: bf16[32,32], index: 5, kind: input, shape index: {}]   ;;  %s869_s6 = inlined_call_operand.vmem [shape: f32[1,32], index: 6, kind: input, shape index: {}]   ;;  %s870_s7 = inlined_call_operand.vmem [shape: f32[32,4], index: 7, kind: input, shape index: {}]   ;;  %s871_s8 = inlined_call_operand.vmem [shape: f32[1,4], index: 8, kind: input, shape index: {}]   ;;  %s872_s9 = inlined_call_operand.vmem [shape: f32[16,4], index: 9, kind: output, shape index: {}]  }
   0x1   :  { %15 = vsyncpa [#allocation5], 0  ;;  %s787_s30 = smov 0  }
   0x2 LB: > { %s257_s12 = sshll.u32 %s864_s1, 4  ;;  %s580_s13 = sadd.s32 4294967295, %s731_s30   ;;  %s731_s30 = sphi %s787_s30, %s21_s30   ;;  %s258_s12 = int_to_ptr.hbm [resolvable:$true] %s257_s12 }
   0x3   : > { %p582_p0 = scmp.ge.s32.totalorder %s731_s30, 1  ;;  %p246_p1 = scmp.lt.s32.totalorder %s731_s30, 3 }
   0x4   : > { %p637_p2 = scmp.eq.s32.totalorder %s580_s13, 0  ;;  %s733_s15 = smov [#allocation2]  }
   0x5   : > { %p798_p3 = pnand %p582_p0, %p246_p1  ;;  %s259_s16 = sshll.u32 %s733_s15, 4  ;;  %s260_s16 = int_to_ptr.vmem [resolvable:$true] %s259_s16 }
   0x6   : > { %s280_s19 = sshll.u32 %s868_s5, 4  ;;  %s734_s20 = smov [#allocation4]   ;;  %s281_s19 = int_to_ptr.hbm [resolvable:$true] %s280_s19 }
   0x7   : > { %p630_p4 = pneg %p798_p3  ;;  %s282_s21 = sshll.u32 %s734_s20, 4  ;;  %s283_s21 = int_to_ptr.vmem [resolvable:$true] %s282_s21 }
   0x8   : > { %s735_s22 = smov 64   ;;  %s736_s23 = smov 4  }
   0x9   : > { %p631_p5 = pnand %p637_p2, %p630_p4  ;;  %314 = sbr.rel (%p798_p3) target bundleno = 560 (0x230), region = 56 }
   0xb   : > { %633 = dma.hbm_to_vmem [thread:$0]  (!%p631_p5), %s258_s12, 128, %s260_s16, [#allocation3], %s735_s22, %s735_s22, %s736_s23  }
   0xc   : > { %636 = dma.hbm_to_vmem [thread:$0]  (!%p631_p5), %s281_s19, 256, %s283_s21, [#allocation5], %s735_s22, %s735_s22, %s736_s23  }
   0xe   : > { %722 = dma.done.wait (%p637_p2), [#allocation3], 128  }
   0xf   : > { %724 = vsyncadd (%p637_p2), [#allocation3], 4294967168 }
  0x10   : > { %726 = dma.done.wait (%p637_p2), [#allocation5], 256  }
  0x11   : > { %728 = vsyncadd (%p637_p2), [#allocation5], 4294967040  ;;  %p354_p6 = scmp.lt.s32.totalorder %s580_s13, 1  ;;  %v617_v0 = vld [vmem:[#allocation2] sm:$0xff]  ;;  %vm377_vm0 = vcmask 130048   ;;  %v619_v3 = vld [vmem:[%s866_s3 + $0x8] sm:$0xff] }
  0x12   : > { %388 = vmatpush.bf16.msra.mxu0 %v617_v0  ;;  %426 = vmatpush.bf16.msra.mxu1 %v619_v3  ;;  %v618_v4 = vld [vmem:[%s866_s3] sm:$0xff]  ;;  %vm416_vm1 = vcmask 261120   ;;  %v621_v11 = vld [vmem:[#allocation4 + $0x8] sm:$0xff]  ;;  %v620_v12 = vld [vmem:[#allocation4] sm:$0xff]  ;;  %vm503_vm2 = vcmask 31744  }
  0x13   : > { %s875_s13 = smov (!%p354_p6, %s580_s13), 1  ;;  %v653_v5 = vld [vmem:[%s865_s2] ss:$0 sm:$0xff]  ;;  %464 = vmatpush.bf16.msra.mxu2 %v621_v11  ;;  %v475_v13 = vld [vmem:[%s870_s7 + $0x18] sm:$0xff]  ;;  %v474_v20 = vld [vmem:[%s870_s7 + $0x10] sm:$0xff] }
  0x14   : > { %s589_s24 = sshll.u32 %s875_s13, 3  ;;  %495 = vmatpush.msra.mxu3 %v475_v13  ;;  %v654_v14 = vld [vmem:[%s867_s4] ss:$0 sm:$0xff]  ;;  %v473_v21 = vld [vmem:[%s870_s7 + $0x8] sm:$0xff] }
  0x15   : > { %s357_s27 = scalar_lea.vmem %s863_s0, %s589_s24  ;;  %v472_v22 = vld [vmem:[%s870_s7] sm:$0xff]  ;;  %s361_s12 = scalar_lea.vmem %s872_s9, %s589_s24 }
  0x16   : > { %v363_v1 = vld [vmem:[%s357_s27] sm:$0xff]  ;;  %427 = vmatpush.bf16.msra.mxu1 %v618_v4  ;;  %496 = vmatpush.msra.mxu3 %v474_v20 }
  0x17   : > { %v367_v2 = vpack.c.bf16 %v363_v1, %v363_v1  ;;  %465 = vmatpush.bf16.msra.mxu2 %v620_v12  ;;  %v655_v23 = vld [vmem:[%s869_s6] ss:$0 sm:$0xff] }
  0x18   : > { %497 = vmatpush.msra.mxu3 %v473_v21  ;;  %v656_v28 = vld [vmem:[%s871_s8] ss:$0 sm:$0xff] }
  0x19   : > { %595 = vmatmul.msk.bf16.vlgmr.msra.gmra.mxu0 %vm377_vm0, %v367_v2 }
  0x1a   : > { %498 = vmatpush.msra.mxu3 %v472_v22 }
  0x96   : > { %v390_v6 = vpop.f32.mrf.mxu0 }
  0x97   : > { %v391_v7 = vadd.f32 %v653_v5, %v390_v6 }
  0x99   : > { %v394_v8 = vmax.f32 %v391_v7, 0.0 }
  0x9b   : > { %v400_v9 = vpack.c.bf16 %v394_v8, %v394_v8 }
  0x9d   : > { %604 = vmatmul.msk.bf16.vlgmr.msra.gmra.mxu1 %vm416_vm1, %v400_v9 }
  0x9e   : > { %v392_v10 = vpop.f32.mrf.mxu0 }
 0x11a   : > { %v429_v15 = vpop.f32.mrf.mxu1 }
 0x11b   : > { %v430_v16 = vadd.f32 %v654_v14, %v429_v15 }
 0x11d   : > { %v433_v17 = vmax.f32 %v430_v16, 0.0 }
 0x11f   : > { %v439_v18 = vpack.c.bf16 %v433_v17, %v433_v17 }
 0x121   : > { %613 = vmatmul.msk.bf16.vlgmr.msra.gmra.mxu2 %vm416_vm1, %v439_v18 }
 0x122   : > { %v431_v19 = vpop.f32.mrf.mxu1 }
 0x1a4   : > { %v467_v24 = vpop.f32.mrf.mxu2 }
 0x1a5   : > { %v468_v25 = vadd.f32 %v655_v23, %v467_v24 }
 0x1a7   : > { %v471_v26 = vmax.f32 %v468_v25, 0.0 }
 0x1a9   : > { %614 = vmatmul.msk.f32.vlgmr.msra.gmra.mxu3 %vm416_vm1, %v471_v26 }
 0x1ac   : > { %v469_v27 = vpop.f32.mrf.mxu2 }
 0x22c   : > { %v500_v29 = vpop.f32.mrf.mxu3 }
 0x22d   : > { %v501_v30 = vadd.f32 %v656_v28, %v500_v29 }
 0x22f   : > { %504 = vst.msk [vmem:[%s361_s12] sm:$0xff] %vm503_vm2, %v501_v30 }
 0x230 PF: > { %s21_s30 = sadd.s32 1, %s731_s30  }
 0x231   : > { %p18_p7 = scmp.ge.s32.totalorder %s21_s30, 4  }
 0x233   :  { %20 = sbr.rel (!%p18_p7) target bundleno = 2 (0x2), region = 95 }
 0x238   :  { %524 = vsyncpa [#allocation3], 1 }
 0x239   :  { %526 = vsyncpa [#allocation3 + $0x1], 1 }
 0x23a   :  { %527 = vsyncpa [#allocation5], 1 }

</bundles_post_ra>
